<compile_context>
chip_gen: v5e
topology: v5e:2x2
jax: 0.10.0
libtpu: 0.0.40
codegen_flags: <defaults>
</compile_context>

<pallas_src>
import math

import numpy as np

import jax
import jax.numpy as jnp
from jax import lax
from jax.experimental import pallas as pl
from jax.experimental.pallas import tpu as pltpu

# ----- static configuration (mirrors GNet.__init__) -----
N = 2            # batch
LATENT = 32      # config.latentVectorDim
C0 = 16          # config.depthScale0
DIM_OUT = 3      # config.dimOutput (RGB)
LEAK = 0.2       # config.leakyReluLeak
EPS = 1e-8       # NormalizationLayer epsilon
HW = 4           # scale-0 spatial side
NPIX = HW * HW
FEAT = NPIX * C0          # 256, flattened per-image feature width
OUT_LANES = 128           # lane-dense padded output width (>= DIM_OUT*NPIX)

# He constants applied at runtime by the Equalized* layers (folded into params)
SCALE_LIN = math.sqrt(2.0 / LATENT)          # EqualizedLinear fan_in = LATENT
SCALE_CONV = math.sqrt(2.0 / (C0 * 3 * 3))   # EqualizedConv2d 3x3 fan_in = C*9
SCALE_RGB = math.sqrt(2.0 / (C0 * 1 * 1))    # EqualizedConv2d 1x1 fan_in = C


def _leaky(x):
    return jnp.maximum(x, LEAK * x)


def gnet_kernel(z_ref, wlin_ref, blin_ref, bd_ref, wconv_ref, bconv_ref,
                wrgb_ref, brgb_ref, out_ref):
    # --- latent pixel-norm over the latent dim of (N, LATENT) ---
    z = z_ref[...]
    z = z * lax.rsqrt(jnp.mean(z * z, axis=-1, keepdims=True) + EPS)

    # --- formatLayer: EqualizedLinear (He scale folded) + leakyReLU ---
    h = jnp.dot(z, wlin_ref[...], preferred_element_type=jnp.float32)
    h = _leaky(h + blin_ref[...])                       # (N, FEAT)

    # --- pixel-norm over channels, in-layout: per-pixel mean via block-diag MXU op ---
    ss = jnp.dot(h * h, bd_ref[...], preferred_element_type=jnp.float32)
    h = h * lax.rsqrt(ss + EPS)

    # --- groupScale0[0]: 3x3 conv (pad=1) as ONE dense (FEAT, FEAT) operator ---
    y = jnp.dot(h, wconv_ref[...], preferred_element_type=jnp.float32)
    y = _leaky(y + bconv_ref[...])                      # (N, FEAT)
    ss2 = jnp.dot(y * y, bd_ref[...], preferred_element_type=jnp.float32)
    y = y * lax.rsqrt(ss2 + EPS)

    # --- toRGB: 1x1 conv to a channel-major (NCHW-flat) lane-dense slab ---
    o = jnp.dot(y, wrgb_ref[...], preferred_element_type=jnp.float32)
    out_ref[...] = o + brgb_ref[...]                    # (N, OUT_LANES)


def prepack_params(Wlin_pt, blin_pt, Wc_pt, bc_pt, Wrgb_pt, brgb_pt):
    """One-time repack of PyTorch-layout parameters into dense operators for
    the (N, FEAT) pixels-major/channels-minor layout, with He constants folded
    in. Runs once per parameter set, outside the per-call forward path."""
    Wlin = np.asarray(Wlin_pt)
    blin_np = np.asarray(blin_pt)
    Wc = np.asarray(Wc_pt)
    bc_np = np.asarray(bc_pt)
    Wr = np.asarray(Wrgb_pt)[:, :, 0, 0]                # (DIM_OUT, C0)
    brgb_np = np.asarray(brgb_pt)

    # Linear: kernel column f' = p*C0 + c  maps from torch feature f = c*NPIX + p.
    p_idx = np.arange(NPIX)
    c_idx = np.arange(C0)
    fprime_to_f = (c_idx[None, :] * NPIX + p_idx[:, None]).reshape(-1)
    wlin = (Wlin[fprime_to_f, :].T * SCALE_LIN).astype(np.float32)   # (LATENT, FEAT)
    blin = (blin_np[fprime_to_f] * SCALE_LIN)[None, :].astype(np.float32)

    # Block-diagonal per-pixel channel-mean operator: NPIX blocks of (C0,C0) = 1/C0.
    bd = np.zeros((FEAT, FEAT), np.float32)
    for p in range(NPIX):
        bd[p * C0:(p + 1) * C0, p * C0:(p + 1) * C0] = 1.0 / C0

    # Dense 3x3 conv (pad=1) operator, boundaries baked in:
    #   out[:, p_out*C0 + c_out] = sum_{p_in,c_in} x[:, p_in*C0 + c_in] * W[c_out,c_in,ky,kx]
    wconv = np.zeros((FEAT, FEAT), np.float32)
    for ho in range(HW):
        for wo in range(HW):
            p_out = ho * HW + wo
            for ky in range(3):
                for kx in range(3):
                    hi, wi = ho + ky - 1, wo + kx - 1
                    if 0 <= hi < HW and 0 <= wi < HW:
                        p_in = hi * HW + wi
                        wconv[p_in * C0:(p_in + 1) * C0,
                              p_out * C0:(p_out + 1) * C0] = \
                            Wc[:, :, ky, kx].T * SCALE_CONV
    bconv = np.tile(bc_np * SCALE_CONV, NPIX)[None, :].astype(np.float32)

    # toRGB dense 1x1 operator emitting channel-major (NCHW-flat) columns:
    #   out column c_out*NPIX + p  <-  input column p*C0 + c_in
    wrgb = np.zeros((FEAT, OUT_LANES), np.float32)
    for p in range(NPIX):
        for co in range(DIM_OUT):
            wrgb[p * C0:(p + 1) * C0, co * NPIX + p] = Wr[co, :] * SCALE_RGB
    brgb = np.zeros((1, OUT_LANES), np.float32)
    brgb[0, :DIM_OUT * NPIX] = np.repeat(brgb_np * SCALE_RGB, NPIX)

    return (jnp.asarray(wlin), jnp.asarray(blin), jnp.asarray(bd),
            jnp.asarray(wconv), jnp.asarray(bconv),
            jnp.asarray(wrgb), jnp.asarray(brgb))


@jax.jit
def gnet_forward(z, packed):
    """z: (N, LATENT); packed = prepack_params(...). Returns NCHW (N, DIM_OUT, 4, 4)."""
    wlin, blin, bd_mean, wconv, bconv, wrgb, brgb = packed
    out_flat = pl.pallas_call(
        gnet_kernel,
        out_shape=jax.ShapeDtypeStruct((N, OUT_LANES), jnp.float32),
        in_specs=[pl.BlockSpec(memory_space=pltpu.MemorySpace.VMEM)] * 8,
        out_specs=pl.BlockSpec(memory_space=pltpu.MemorySpace.VMEM),
    )(z, wlin, blin, bd_mean, wconv, bconv, wrgb, brgb)
    # Output columns are already NCHW-flat (c*16 + h*4 + w): slice + reshape only.
    return out_flat[:, :DIM_OUT * NPIX].reshape(N, DIM_OUT, HW, HW)


def reference(z, Wlin_pt, blin_pt, Wc_pt, bc_pt, Wrgb_pt, brgb_pt):
    """Pure-JAX reference mirroring the PyTorch forward (NCHW)."""
    def pn(x, axis):
        return x * lax.rsqrt(jnp.mean(x * x, axis=axis, keepdims=True) + EPS)

    x = pn(z, 1)
    x = (x @ Wlin_pt.T + blin_pt) * SCALE_LIN
    x = jnp.maximum(x, LEAK * x)
    x = x.reshape(N, C0, HW, HW)
    x = pn(x, 1)
    y = lax.conv_general_dilated(x, Wc_pt, (1, 1), ((1, 1), (1, 1)),
                                 dimension_numbers=('NCHW', 'OIHW', 'NCHW'))
    y = (y + bc_pt[None, :, None, None]) * SCALE_CONV
    y = jnp.maximum(y, LEAK * y)
    y = pn(y, 1)
    o = lax.conv_general_dilated(y, Wrgb_pt, (1, 1), ((0, 0), (0, 0)),
                                 dimension_numbers=('NCHW', 'OIHW', 'NCHW'))
    o = (o + brgb_pt[None, :, None, None]) * SCALE_RGB
    return o


if __name__ == "__main__":
    key = jax.random.PRNGKey(0)
    k_z, k_lin, k_c, k_rgb, k_bl, k_bc, k_br = jax.random.split(key, 7)

    # latent input
    z = jax.random.normal(k_z, (N, LATENT), jnp.float32)

    # Equalized-lR init: weights ~ N(0, 1). Biases made nonzero here to also
    # exercise the "bias is scaled by the He constant" path.
    Wlin_pt = jax.random.normal(k_lin, (NPIX * C0, LATENT), jnp.float32)
    blin_pt = 0.1 * jax.random.normal(k_bl, (NPIX * C0,), jnp.float32)
    Wc_pt = jax.random.normal(k_c, (C0, C0, 3, 3), jnp.float32)
    bc_pt = 0.1 * jax.random.normal(k_bc, (C0,), jnp.float32)
    Wrgb_pt = jax.random.normal(k_rgb, (DIM_OUT, C0, 1, 1), jnp.float32)
    brgb_pt = 0.1 * jax.random.normal(k_br, (DIM_OUT,), jnp.float32)

    # One-time parameter repack (hoisted out of the per-call jit path).
    packed = prepack_params(Wlin_pt, blin_pt, Wc_pt, bc_pt, Wrgb_pt, brgb_pt)
    packed = jax.tree_util.tree_map(jax.block_until_ready, packed)

    out = gnet_forward(z, packed)
    out = jax.block_until_ready(out)

    ref = reference(z, Wlin_pt, blin_pt, Wc_pt, bc_pt, Wrgb_pt, brgb_pt)
    assert out.shape == (N, DIM_OUT, HW, HW), out.shape
    assert jnp.allclose(out, ref, rtol=1e-4, atol=1e-4), "mismatch vs reference"

    # TODO(synk): addScale/Upscale2d branches and alpha-blending path (len(scaleLayers)>0)
    # are not exercised by the base GNet construction and are not implemented here.
    print("KERNEL_OK")
</pallas_src>

<mosaic_0001>
module attributes {stable_mosaic.version = 11 : i64} {
  func.func @gnet_kernel(%arg0: memref<2x32xf32, #tpu.memory_space<vmem>>, %arg1: memref<32x256xf32, #tpu.memory_space<vmem>>, %arg2: memref<1x256xf32, #tpu.memory_space<vmem>>, %arg3: memref<256x256xf32, #tpu.memory_space<vmem>>, %arg4: memref<256x256xf32, #tpu.memory_space<vmem>>, %arg5: memref<1x256xf32, #tpu.memory_space<vmem>>, %arg6: memref<256x128xf32, #tpu.memory_space<vmem>>, %arg7: memref<1x128xf32, #tpu.memory_space<vmem>>, %arg8: memref<2x128xf32, #tpu.memory_space<vmem>>) attributes {dimension_semantics = [], scalar_prefetch = 0 : i64, scratch_operands = 0 : i64, tpu.core_type = #tpu.core_type<tc>} {
    %c0 = arith.constant 0 : index
    %c0_0 = arith.constant 0 : index
    %0 = vector.load %arg0[%c0, %c0_0] : memref<2x32xf32, #tpu.memory_space<vmem>>, vector<2x32xf32>
    %1 = arith.mulf %0, %0 : vector<2x32xf32>
    %cst = arith.constant dense<0.000000e+00> : vector<2xf32>
    %2 = vector.multi_reduction <add>, %1, %cst [1] : vector<2x32xf32> to vector<2xf32>
    %3 = vector.shape_cast %2 : vector<2xf32> to vector<2x1xf32>
    %cst_1 = arith.constant 3.200000e+01 : f32
    %4 = vector.broadcast %cst_1 : f32 to vector<2x1xf32>
    %5 = arith.divf %3, %4 : vector<2x1xf32>
    %cst_2 = arith.constant 9.99999993E-9 : f32
    %6 = vector.broadcast %cst_2 : f32 to vector<2x1xf32>
    %7 = arith.addf %5, %6 : vector<2x1xf32>
    %8 = math.rsqrt %7 : vector<2x1xf32>
    %9 = vector.broadcast %8 : vector<2x1xf32> to vector<2x32xf32>
    %10 = arith.mulf %0, %9 : vector<2x32xf32>
    %c0_3 = arith.constant 0 : index
    %c0_4 = arith.constant 0 : index
    %11 = vector.load %arg1[%c0_3, %c0_4] : memref<32x256xf32, #tpu.memory_space<vmem>>, vector<32x256xf32>
    %cst_5 = arith.constant dense<0.000000e+00> : vector<2x256xf32>
    %12 = tpu.matmul %10, %11, %cst_5 {dimension_numbers = #tpu.dot_dimension_numbers<[1], [0], [0], [1], [0, 0, 1, 1], [], []>} : vector<2x32xf32>, vector<32x256xf32>, vector<2x256xf32> -> vector<2x256xf32>
    %c0_6 = arith.constant 0 : index
    %c0_7 = arith.constant 0 : index
    %13 = vector.load %arg2[%c0_6, %c0_7] : memref<1x256xf32, #tpu.memory_space<vmem>>, vector<1x256xf32>
    %14 = vector.broadcast %13 : vector<1x256xf32> to vector<2x256xf32>
    %15 = arith.addf %12, %14 : vector<2x256xf32>
    %cst_8 = arith.constant 2.000000e-01 : f32
    %16 = vector.broadcast %cst_8 : f32 to vector<2x256xf32>
    %17 = arith.mulf %16, %15 : vector<2x256xf32>
    %18 = arith.maximumf %15, %17 : vector<2x256xf32>
    %19 = arith.mulf %18, %18 : vector<2x256xf32>
    %c0_9 = arith.constant 0 : index
    %c0_10 = arith.constant 0 : index
    %20 = vector.load %arg3[%c0_9, %c0_10] : memref<256x256xf32, #tpu.memory_space<vmem>>, vector<256x256xf32>
    %cst_11 = arith.constant dense<0.000000e+00> : vector<2x256xf32>
    %21 = tpu.matmul %19, %20, %cst_11 {dimension_numbers = #tpu.dot_dimension_numbers<[1], [0], [0], [1], [0, 0, 1, 1], [], []>} : vector<2x256xf32>, vector<256x256xf32>, vector<2x256xf32> -> vector<2x256xf32>
    %cst_12 = arith.constant 9.99999993E-9 : f32
    %22 = vector.broadcast %cst_12 : f32 to vector<2x256xf32>
    %23 = arith.addf %21, %22 : vector<2x256xf32>
    %24 = math.rsqrt %23 : vector<2x256xf32>
    %25 = arith.mulf %18, %24 : vector<2x256xf32>
    %c0_13 = arith.constant 0 : index
    %c0_14 = arith.constant 0 : index
    %26 = vector.load %arg4[%c0_13, %c0_14] : memref<256x256xf32, #tpu.memory_space<vmem>>, vector<256x256xf32>
    %cst_15 = arith.constant dense<0.000000e+00> : vector<2x256xf32>
    %27 = tpu.matmul %25, %26, %cst_15 {dimension_numbers = #tpu.dot_dimension_numbers<[1], [0], [0], [1], [0, 0, 1, 1], [], []>} : vector<2x256xf32>, vector<256x256xf32>, vector<2x256xf32> -> vector<2x256xf32>
    %c0_16 = arith.constant 0 : index
    %c0_17 = arith.constant 0 : index
    %28 = vector.load %arg5[%c0_16, %c0_17] : memref<1x256xf32, #tpu.memory_space<vmem>>, vector<1x256xf32>
    %29 = vector.broadcast %28 : vector<1x256xf32> to vector<2x256xf32>
    %30 = arith.addf %27, %29 : vector<2x256xf32>
    %cst_18 = arith.constant 2.000000e-01 : f32
    %31 = vector.broadcast %cst_18 : f32 to vector<2x256xf32>
    %32 = arith.mulf %31, %30 : vector<2x256xf32>
    %33 = arith.maximumf %30, %32 : vector<2x256xf32>
    %34 = arith.mulf %33, %33 : vector<2x256xf32>
    %c0_19 = arith.constant 0 : index
    %c0_20 = arith.constant 0 : index
    %35 = vector.load %arg3[%c0_19, %c0_20] : memref<256x256xf32, #tpu.memory_space<vmem>>, vector<256x256xf32>
    %cst_21 = arith.constant dense<0.000000e+00> : vector<2x256xf32>
    %36 = tpu.matmul %34, %35, %cst_21 {dimension_numbers = #tpu.dot_dimension_numbers<[1], [0], [0], [1], [0, 0, 1, 1], [], []>} : vector<2x256xf32>, vector<256x256xf32>, vector<2x256xf32> -> vector<2x256xf32>
    %cst_22 = arith.constant 9.99999993E-9 : f32
    %37 = vector.broadcast %cst_22 : f32 to vector<2x256xf32>
    %38 = arith.addf %36, %37 : vector<2x256xf32>
    %39 = math.rsqrt %38 : vector<2x256xf32>
    %40 = arith.mulf %33, %39 : vector<2x256xf32>
    %c0_23 = arith.constant 0 : index
    %c0_24 = arith.constant 0 : index
    %41 = vector.load %arg6[%c0_23, %c0_24] : memref<256x128xf32, #tpu.memory_space<vmem>>, vector<256x128xf32>
    %cst_25 = arith.constant dense<0.000000e+00> : vector<2x128xf32>
    %42 = tpu.matmul %40, %41, %cst_25 {dimension_numbers = #tpu.dot_dimension_numbers<[1], [0], [0], [1], [0, 0, 1, 1], [], []>} : vector<2x256xf32>, vector<256x128xf32>, vector<2x128xf32> -> vector<2x128xf32>
    %c0_26 = arith.constant 0 : index
    %c0_27 = arith.constant 0 : index
    %43 = vector.load %arg7[%c0_26, %c0_27] : memref<1x128xf32, #tpu.memory_space<vmem>>, vector<1x128xf32>
    %44 = vector.broadcast %43 : vector<1x128xf32> to vector<2x128xf32>
    %45 = arith.addf %42, %44 : vector<2x128xf32>
    %c0_28 = arith.constant 0 : index
    %c0_29 = arith.constant 0 : index
    %46 = vector.load %arg8[%c0_28, %c0_29] : memref<2x128xf32, #tpu.memory_space<vmem>>, vector<2x128xf32>
    tpu.vector_store %arg8[%c0_28, %c0_29], %45 {strides = array<i32>} : memref<2x128xf32, #tpu.memory_space<vmem>>, vector<2x128xf32>,
    return
  }
}

</mosaic_0001>

<bundles_post_ra>
// kernel: gnet_forward.1
= control target key start
LH: loop header
LB: loop body
LE: loop exit
PB: predicated region body
PF: predicated region fallthrough
CT: control target
= control target key end

     0   :  { %13 = vsyncpa [#allocation3], 0  ;;  %s1269_s0 = inlined_call_operand.hbm [shape: f32[2,32], index: 0, kind: input, shape index: {}]   ;;  %s1270_s1 = inlined_call_operand.hbm [shape: f32[32,256], index: 1, kind: input, shape index: {}]   ;;  %s1271_s2 = inlined_call_operand.hbm [shape: f32[1,256], index: 2, kind: input, shape index: {}]   ;;  %s1272_s3 = inlined_call_operand.hbm [shape: f32[256,256], index: 3, kind: input, shape index: {}]   ;;  %s1273_s4 = inlined_call_operand.hbm [shape: f32[256,256], index: 4, kind: input, shape index: {}]   ;;  %s1274_s5 = inlined_call_operand.vmem [shape: f32[1,256], index: 5, kind: input, shape index: {}]   ;;  %s1275_s6 = inlined_call_operand.hbm [shape: f32[256,128], index: 6, kind: input, shape index: {}]   ;;  %s1276_s7 = inlined_call_operand.vmem [shape: f32[1,128], index: 7, kind: input, shape index: {}]   ;;  %s1277_s8 = inlined_call_operand.vmem [shape: f32[2,128], index: 8, kind: output, shape index: {}]  }
   0x1   :  { %14 = vsyncpa [#allocation5], 0 }
   0x2   :  { %15 = vsyncpa [#allocation8], 0  ;;  %s32_s29 = sshll.u32 %s1270_s1, 4  ;;  %s33_s29 = int_to_ptr.hbm [resolvable:$true] %s32_s29 }
   0x3   :  { %16 = vsyncpa [#allocation11], 0  ;;  %s896_s30 = smov [#allocation4]   ;;  %s56_s12 = sshll.u32 %s1272_s3, 4  ;;  %s57_s12 = int_to_ptr.hbm [resolvable:$true] %s56_s12 }
   0x4   :  { %s34_s9 = sshll.u32 %s896_s30, 4  ;;  %s897_s13 = smov 256   ;;  %s35_s9 = int_to_ptr.vmem [resolvable:$true] %s34_s9 }
   0x5   :  { %s898_s14 = smov 16   ;;  %s899_s15 = smov [#allocation7]  }
   0x6   :  { %40 = dma.hbm_to_vmem [thread:$0]  %s33_s29, 1024, %s35_s9, [#allocation5], %s897_s13, %s897_s13, %s898_s14  }
   0x7   :  { %s58_s16 = sshll.u32 %s899_s15, 4  ;;  %s22_s18 = sshll.u32 %s1269_s0, 4  ;;  %s59_s16 = int_to_ptr.vmem [resolvable:$true] %s58_s16  ;;  %s23_s18 = int_to_ptr.hbm [resolvable:$true] %s22_s18 }
   0x8   :  { %64 = dma.hbm_to_vmem [thread:$0]  %s57_s12, 8192, %s59_s16, [#allocation8], %s897_s13, %s897_s13, %s898_s14  }
   0x9   :  { %s46_s20 = sshll.u32 %s1271_s2, 4  ;;  %s900_s21 = smov [#allocation2]   ;;  %s47_s20 = int_to_ptr.hbm [resolvable:$true] %s46_s20 }
   0xa   :  { %s24_s22 = sshll.u32 %s900_s21, 4  ;;  %s901_s23 = smov [#allocation6]   ;;  %s25_s22 = int_to_ptr.vmem [resolvable:$true] %s24_s22 }
   0xb   :  { %27 = dma.hbm_to_vmem [thread:$0]  %s23_s18, 32, %s25_s22, [#allocation3]  }
   0xc   :  { %s48_s24 = sshll.u32 %s901_s23, 4  ;;  %s69_s0 = sshll.u32 %s1273_s4, 4  ;;  %s49_s24 = int_to_ptr.vmem [resolvable:$true] %s48_s24  ;;  %s70_s0 = int_to_ptr.hbm [resolvable:$true] %s69_s0 }
   0xd   :  { %51 = dma.hbm_to_vmem [thread:$0]  %s47_s20, 32, %s49_s24, [#allocation5]  }
   0xe   :  { %s84_s29 = sshll.u32 %s1275_s6, 4  ;;  %s902_s30 = smov [#allocation9]   ;;  %s85_s29 = int_to_ptr.hbm [resolvable:$true] %s84_s29 }
   0xf   :  { %s71_s2 = sshll.u32 %s902_s30, 4  ;;  %s903_s9 = smov [#allocation10]   ;;  %s72_s2 = int_to_ptr.vmem [resolvable:$true] %s71_s2 }
  0x10   :  { %77 = dma.hbm_to_vmem [thread:$0]  %s70_s0, 8192, %s72_s2, [#allocation8], %s897_s13, %s897_s13, %s898_s14  }
  0x11   :  { %s86_s10 = sshll.u32 %s903_s9, 4  ;;  %s904_s11 = smov 128   ;;  %s87_s10 = int_to_ptr.vmem [resolvable:$true] %s86_s10 }
  0x12   :  { %s905_s4 = smov 8  }
  0x13   :  { %92 = dma.hbm_to_vmem [thread:$0]  %s85_s29, 4096, %s87_s10, [#allocation11], %s904_s11, %s904_s11, %s905_s4  }
  0x14   :  { %888 = dma.done.wait [#allocation3], 32  }
  0x15   :  { %889 = vsyncadd [#allocation3], 4294967264 }
  0x16   :  { %890 = dma.done.wait [#allocation5], 1056  }
  0x17   :  { %891 = vsyncadd [#allocation5], 4294966240 }
  0x18   :  { %892 = dma.done.wait [#allocation8], 16384  }
  0x19   :  { %893 = vsyncadd [#allocation8], 4294950912 }
  0x1a   :  { %894 = dma.done.wait [#allocation11], 4096  }
  0x1b   :  { %895 = vsyncadd [#allocation11], 4294963200  ;;  %v979_v0 = vld [vmem:[#allocation2] sm:$0x3]  ;;  %vm121_vm0 = vcmask 254976   ;;  %v906_v3 = vmov 32.0  }
  0x1c   :  { %v120_v1 = vmul.f32 %v979_v0, %v979_v0  ;;  %732 = vrcp.f32 %v906_v3  ;;  %v151_v6 = vld [vmem:[#allocation4 + $0x30] sm:$0xff]  ;;  %v152_v7 = vld [vmem:[#allocation4 + $0x38] sm:$0xff]  ;;  %v149_v9 = vld [vmem:[#allocation4 + $0x20] sm:$0xff]  ;;  %vm159_vm5 = vcmask 261120  }
  0x1d   :  { %175 = vmatpush.msra.mxu0 %v151_v6  ;;  %195 = vmatpush.msra.mxu1 %v152_v7  ;;  %v150_v10 = vld [vmem:[#allocation4 + $0x28] sm:$0xff]  ;;  %v147_v11 = vld [vmem:[#allocation4 + $0x10] sm:$0xff]  ;;  %v148_v12 = vld [vmem:[#allocation4 + $0x18] sm:$0xff] }
  0x1e   :  { %v122_v2 = vsel %vm121_vm0, %v120_v1, 0.0  ;;  %v145_v13 = vld [vmem:[#allocation4] sm:$0xff]  ;;  %v146_v14 = vld [vmem:[#allocation4 + $0x8] sm:$0xff]  ;;  %v983_v16 = vld [vmem:[#allocation7 + $0xf0] sm:$0xff] }
  0x1f   :  { %123 = vadd.xlane.f32.xlu0 %v122_v2  ;;  %176 = vmatpush.msra.mxu0 %v149_v9  ;;  %v985_v17 = vld [vmem:[#allocation7 + $0x1f0] sm:$0xff]  ;;  %v987_v18 = vld [vmem:[#allocation7 + $0xf8] sm:$0xff]  ;;  %v993_v21 = vld [vmem:[#allocation7 + $0xe0] sm:$0xff] }
  0x20   :  { %196 = vmatpush.msra.mxu1 %v150_v10  ;;  %273 = vmatpush.msra.mxu2 %v983_v16  ;;  %v991_v20 = vld [vmem:[#allocation7 + $0x1f8] sm:$0xff]  ;;  %v995_v22 = vld [vmem:[#allocation7 + $0x1e0] sm:$0xff]  ;;  %v999_v23 = vld [vmem:[#allocation7 + $0xe8] sm:$0xff] }
  0x21   :  { %177 = vmatpush.msra.mxu0 %v147_v11  ;;  %293 = vmatpush.msra.mxu3 %v985_v17  ;;  %v1001_v24 = vld [vmem:[#allocation7 + $0x1e8] sm:$0xff]  ;;  %v1003_v25 = vld [vmem:[#allocation7 + $0xd0] sm:$0xff]  ;;  %v1009_v27 = vld [vmem:[#allocation7 + $0xd8] sm:$0xff] }
  0x22   :  { %v733_v4 = vpop.eup %732  ;;  %197 = vmatpush.msra.mxu1 %v148_v12  ;;  %274 = vmatpush.msra.mxu2 %v993_v21  ;;  %v1007_v26 = vld [vmem:[#allocation7 + $0x1d0] sm:$0xff]  ;;  %v1011_v28 = vld [vmem:[#allocation7 + $0x1d8] sm:$0xff]  ;;  %v1015_v29 = vld [vmem:[#allocation7 + $0xc0] sm:$0xff] }
  0x23   :  { %v126_v5 = vmul.f32 32.0, %v733_v4  ;;  %178 = vmatpush.msra.mxu0 %v145_v13  ;;  %vm130_vm1 = vweird.f32 %v733_v4  ;;  %294 = vmatpush.msra.mxu3 %v995_v22  ;;  %v1017_v30 = vld [vmem:[#allocation7 + $0x1c0] sm:$0xff]  ;;  %v1021_v32 = vld [vmem:[#allocation7 + $0xc8] sm:$0xff]  ;;  %v1027_v34 = vld [vmem:[#allocation7 + $0xb0] sm:$0xff] }
  0x24   :  { %198 = vmatpush.msra.mxu1 %v146_v14  ;;  %275 = vmatpush.msra.mxu2 %v1003_v25  ;;  %v1023_v33 = vld [vmem:[#allocation7 + $0x1c8] sm:$0xff]  ;;  %v1029_v35 = vld [vmem:[#allocation7 + $0x1b0] sm:$0xff]  ;;  %v1033_v37 = vld [vmem:[#allocation7 + $0xb8] sm:$0xff] }
  0x25   :  { %v127_v8 = vsub.f32 1.0, %v126_v5  ;;  %313 = vmatpush.msrb.mxu0 %v987_v18  ;;  %295 = vmatpush.msra.mxu3 %v1007_v26  ;;  %v1035_v38 = vld [vmem:[#allocation7 + $0x1b8] sm:$0xff]  ;;  %v1039_v40 = vld [vmem:[#allocation7 + $0xa0] sm:$0xff]  ;;  %v1045_v42 = vld [vmem:[#allocation7 + $0xa8] sm:$0xff] }
  0x26   :  { %333 = vmatpush.msrb.mxu1 %v991_v20  ;;  %276 = vmatpush.msra.mxu2 %v1015_v29  ;;  %v1041_v41 = vld [vmem:[#allocation7 + $0x1a0] sm:$0xff]  ;;  %v1047_v43 = vld [vmem:[#allocation7 + $0x1a8] sm:$0xff]  ;;  %v1051_v45 = vld [vmem:[#allocation7 + $0x90] sm:$0xff] }
  0x27   :  { %v128_v15 = vmul.f32 %v733_v4, %v127_v8  ;;  %314 = vmatpush.msrb.mxu0 %v999_v23  ;;  %296 = vmatpush.msra.mxu3 %v1017_v30  ;;  %v1053_v46 = vld [vmem:[#allocation7 + $0x190] sm:$0xff]  ;;  %v1057_v47 = vld [vmem:[#allocation7 + $0x98] sm:$0xff]  ;;  %v1063_v49 = vld [vmem:[#allocation7 + $0x80] sm:$0xff] }
  0x28   :  { %334 = vmatpush.msrb.mxu1 %v1001_v24  ;;  %277 = vmatpush.msra.mxu2 %v1027_v34  ;;  %v1059_v48 = vld [vmem:[#allocation7 + $0x198] sm:$0xff]  ;;  %v1065_v50 = vld [vmem:[#allocation7 + $0x180] sm:$0xff]  ;;  %v1069_v51 = vld [vmem:[#allocation7 + $0x88] sm:$0xff] }
  0x29   :  { %v129_v19 = vadd.f32 %v733_v4, %v128_v15  ;;  %315 = vmatpush.msrb.mxu0 %v1009_v27  ;;  %297 = vmatpush.msra.mxu3 %v1029_v35  ;;  %v1071_v52 = vld [vmem:[#allocation7 + $0x188] sm:$0xff]  ;;  %v1075_v53 = vld [vmem:[#allocation7 + $0x70] sm:$0xff]  ;;  %v1081_v55 = vld [vmem:[#allocation7 + $0x78] sm:$0xff] }
  0x2a   :  { %335 = vmatpush.msrb.mxu1 %v1011_v28  ;;  %278 = vmatpush.msra.mxu2 %v1039_v40  ;;  %v1077_v54 = vld [vmem:[#allocation7 + $0x170] sm:$0xff]  ;;  %v1083_v56 = vld [vmem:[#allocation7 + $0x178] sm:$0xff]  ;;  %v1087_v57 = vld [vmem:[#allocation7 + $0x60] sm:$0xff] }
  0x2b   :  { %v131_v31 = vsel %vm130_vm1, %v733_v4, %v129_v19  ;;  %316 = vmatpush.msrb.mxu0 %v1021_v32  ;;  %298 = vmatpush.msra.mxu3 %v1041_v41  ;;  %v1089_v58 = vld [vmem:[#allocation7 + $0x160] sm:$0xff]  ;;  %v1093_v59 = vld [vmem:[#allocation7 + $0x68] sm:$0xff]  ;;  %v1099_v62 = vld [vmem:[#allocation7 + $0x50] sm:$0xff] }
  0x2c   :  { %336 = vmatpush.msrb.mxu1 %v1023_v33  ;;  %279 = vmatpush.msra.mxu2 %v1051_v45  ;;  %v1095_v60 = vld [vmem:[#allocation7 + $0x168] sm:$0xff]  ;;  %v1101_v63 = vld [vmem:[#allocation7 + $0x150] sm:$0xff]  ;;  %v1105_v2 = vld [vmem:[#allocation7 + $0x58] sm:$0xff] }
  0x2d   :  { %317 = vmatpush.msrb.mxu0 %v1033_v37  ;;  %299 = vmatpush.msra.mxu3 %v1053_v46  ;;  %1294 = vst [vmem:[#allocation16_spill] sm:$0xff] %v1105_v2  ;;  %v1107_v3 = vld [vmem:[#allocation7 + $0x158] sm:$0xff]  ;;  %v1116_v10 = vld [vmem:[#allocation7 + $0x40] sm:$0xff]  ;;  %v1120_v12 = vld [vmem:[#allocation7 + $0x48] sm:$0xff] }
  0x2e   :  { %337 = vmatpush.msrb.mxu1 %v1035_v38  ;;  %280 = vmatpush.msra.mxu2 %v1063_v49  ;;  %1295 = vst [vmem:[#allocation17_spill] sm:$0xff] %v1116_v10  ;;  %v1118_v11 = vld [vmem:[#allocation7 + $0x140] sm:$0xff]  ;;  %v1124_v13 = vld [vmem:[#allocation7 + $0x148] sm:$0xff]  ;;  %v1128_v14 = vld [vmem:[#allocation7 + $0x30] sm:$0xff] }
  0x2f   :  { %318 = vmatpush.msrb.mxu0 %v1045_v42  ;;  %300 = vmatpush.msra.mxu3 %v1065_v50  ;;  %1296 = vst [vmem:[#allocation18_spill] sm:$0xff] %v1120_v12  ;;  %v1132_v15 = vld [vmem:[#allocation7 + $0x38] sm:$0xff] }
  0x30   :  { %338 = vmatpush.msrb.mxu1 %v1047_v43  ;;  %281 = vmatpush.msra.mxu2 %v1075_v53  ;;  %1297 = vst [vmem:[#allocation19_spill] sm:$0xff] %v1128_v14  ;;  %v1136_v19 = vld [vmem:[#allocation7 + $0x138] sm:$0xff] }
  0x31   :  { %319 = vmatpush.msrb.mxu0 %v1057_v47  ;;  %301 = vmatpush.msra.mxu3 %v1077_v54  ;;  %1298 = vst [vmem:[#allocation20_spill] sm:$0xff] %v1132_v15 }
  0x32   :  { %339 = vmatpush.msrb.mxu1 %v1059_v48  ;;  %282 = vmatpush.msra.mxu2 %v1087_v57 }
  0x33   :  { %320 = vmatpush.msrb.mxu0 %v1069_v51  ;;  %302 = vmatpush.msra.mxu3 %v1089_v58 }
  0x34   :  { %340 = vmatpush.msrb.mxu1 %v1071_v52  ;;  %283 = vmatpush.msra.mxu2 %v1099_v62 }
  0x35   :  { %321 = vmatpush.msrb.mxu0 %v1081_v55  ;;  %303 = vmatpush.msra.mxu3 %v1101_v63 }
  0x36   :  { %341 = vmatpush.msrb.mxu1 %v1083_v56  ;;  %284 = vmatpush.msra.mxu2 %v1116_v10 }
  0x37   :  { %322 = vmatpush.msrb.mxu0 %v1093_v59  ;;  %304 = vmatpush.msra.mxu3 %v1118_v11 }
  0x38   :  { %342 = vmatpush.msrb.mxu1 %v1095_v60  ;;  %285 = vmatpush.msra.mxu2 %v1128_v14  ;;  %v434_v14 = vld [vmem:[#allocation9 + $0x1d8] sm:$0xff] }
  0x39   :  { %323 = vmatpush.msrb.mxu0 %v1105_v2 }
  0x3a   :  { %343 = vmatpush.msrb.mxu1 %v1107_v3 }
  0x3b   :  { %324 = vmatpush.msrb.mxu0 %v1120_v12 }
  0x3c   :  { %344 = vmatpush.msrb.mxu1 %v1124_v13 }
  0x3d   :  { %325 = vmatpush.msrb.mxu0 %v1132_v15  ;;  %v433_v15 = vld [vmem:[#allocation9 + $0x1d0] sm:$0xff] }
  0x3e   :  { %345 = vmatpush.msrb.mxu1 %v1136_v19 }
  0x92   :  { %v124_v36 = vpop.xlane.xlu0 %123 }
  0x93   :  { %v132_v39 = vmul.f32 %v131_v31, %v124_v36  ;;  %v1140_v31 = vld [vmem:[#allocation7 + $0x20] sm:$0xff] }
  0x94   :  { %1299 = vst [vmem:[#allocation21_spill] sm:$0xff] %v1140_v31  ;;  %v1142_v36 = vld [vmem:[#allocation7 + $0x120] sm:$0xff]  ;;  %286 = vmatpush.msra.mxu2 %v1140_v31 }
  0x95   :  { %v133_v44 = vadd.f32 1e-08, %v132_v39  ;;  %v1144_v39 = vld [vmem:[#allocation7 + $0x28] sm:$0xff]  ;;  %v435_v31 = vld [vmem:[#allocation9 + $0x1e0] sm:$0xff] }
  0x96   :  { %1300 = vst [vmem:[#allocation22_spill] sm:$0xff] %v1144_v39  ;;  %326 = vmatpush.msrb.mxu0 %v1144_v39  ;;  %v438_v39 = vld [vmem:[#allocation9 + $0x1f8] sm:$0xff] }
  0x97   :  { %734 = vrsqrt.f32 %v133_v44  ;;  %vm140_vm3 = vweird.f32 %v133_v44 }
  0x9d   :  { %v735_v61 = vpop.eup %734 }
  0x9e   :  { %v135_v1 = vmul.f32 %v735_v61, %v133_v44  ;;  %vm141_vm2 = vweird.f32 %v735_v61  ;;  %v1148_v44 = vld [vmem:[#allocation7 + $0x128] sm:$0xff] }
  0x9f   :  { %vm142_vm4 = vmor %vm140_vm3, %vm141_vm2  ;;  %1301 = vst [vmem:[#allocation23_spill] sm:$0xff] %v1148_v44  ;;  %346 = vmatpush.msrb.mxu1 %v1148_v44 }
  0xa0   :  { %v136_v4 = vmul.f32 %v735_v61, %v135_v1  ;;  %v1154_v1 = vld [vmem:[#allocation7 + $0x110] sm:$0xff] }
  0xa1   :  { %1303 = vst [vmem:[#allocation25_spill] sm:$0xff] %v1154_v1 }
  0xa2   :  { %v137_v5 = vmul.f32 0.5, %v136_v4  ;;  %v1156_v4 = vld [vmem:[#allocation7 + $0x18] sm:$0xff] }
  0xa3   :  { %1304 = vst [vmem:[#allocation26_spill] sm:$0xff] %v1156_v4  ;;  %327 = vmatpush.msrb.mxu0 %v1156_v4  ;;  %v436_v4 = vld [vmem:[#allocation9 + $0x1e8] sm:$0xff] }
  0xa4   :  { %v138_v6 = vsub.f32 1.5, %v137_v5  ;;  %v1160_v5 = vld [vmem:[#allocation7 + $0x118] sm:$0xff] }
  0xa5   :  { %1305 = vst [vmem:[#allocation27_spill] sm:$0xff] %v1160_v5  ;;  %347 = vmatpush.msrb.mxu1 %v1160_v5  ;;  %v153_v5 = vld [vmem:[#allocation6] sm:$0x3] }
  0xa6   :  { %v139_v7 = vmul.f32 %v735_v61, %v138_v6  ;;  %v1162_v6 = vld [vmem:[#allocation7] sm:$0xff]  ;;  %v156_v12 = vperm.slane %v153_v5, 1 }
  0xa7   :  { %1306 = vst [vmem:[#allocation28_spill] sm:$0xff] %v1162_v6 }
  0xa8   :  { %v143_v8 = vsel %vm142_vm4, %v735_v61, %v139_v7  ;;  %v1152_v61 = vld [vmem:[#allocation7 + $0x10] sm:$0xff]  ;;  %v1164_v7 = vld [vmem:[#allocation7 + $0x100] sm:$0xff] }
  0xa9   :  { %v144_v9 = vmul.f32 %v143_v8, %v979_v0  ;;  %v1130_v0 = vld [vmem:[#allocation7 + $0x130] sm:$0xff]  ;;  %1302 = vst [vmem:[#allocation24_spill] sm:$0xff] %v1152_v61  ;;  %287 = vmatpush.msra.mxu2 %v1152_v61  ;;  %v1168_v8 = vld [vmem:[#allocation7 + $0x8] sm:$0xff] }
  0xaa   :  { %305 = vmatpush.msra.mxu3 %v1130_v0  ;;  %1307 = vst [vmem:[#allocation29_spill] sm:$0xff] %v1164_v7  ;;  %328 = vmatpush.msrb.mxu0 %v1168_v8  ;;  %v437_v61 = vld [vmem:[#allocation9 + $0x1f0] sm:$0xff] }
  0xab   :  { %718 = vmatmul.msk.f32.vlgmr.msra.gmra.mxu0 %vm159_vm5, %v144_v9  ;;  %719 = vmatmul.msk.f32.vlgmr.msra.gmra.mxu1 %vm159_vm5, %v144_v9  ;;  %1308 = vst [vmem:[#allocation30_spill] sm:$0xff] %v1168_v8  ;;  %v1170_v9 = vld [vmem:[#allocation7 + $0x108] sm:$0xff] }
  0xac   :  { %306 = vmatpush.msra.mxu3 %v1142_v36  ;;  %1309 = vst [vmem:[#allocation31_spill] sm:$0xff] %v1170_v9  ;;  %288 = vmatpush.msra.mxu2 %v1162_v6  ;;  %v155_v6 = vperm.slane %v153_v5, 0  ;;  %v430_v5 = vld [vmem:[#allocation9 + $0x1b8] sm:$0xff] }
  0xad   :  { %348 = vmatpush.msrb.mxu1 %v1170_v9 }
  0xae   :  { %307 = vmatpush.msra.mxu3 %v1154_v1 }
  0xaf   :  { %505 = vmatpush.msra.mxu1 %v438_v39 }
  0xb0   :  { %308 = vmatpush.msra.mxu3 %v1164_v7 }
  0xb1   :  { %506 = vmatpush.msra.mxu1 %v436_v4  ;;  %v406_v4 = vld [vmem:[#allocation9 + $0xf8] sm:$0xff] }
  0xb2   :  { %465 = vmatpush.msrb.mxu3 %v437_v61  ;;  %485 = vmatpush.msra.mxu0 %v406_v4  ;;  %v397_v4 = vld [vmem:[#allocation9 + $0xb0] sm:$0xff] }
  0xb3   :  { %507 = vmatpush.msra.mxu1 %v434_v14  ;;  %v405_v14 = vld [vmem:[#allocation9 + $0xf0] sm:$0xff] }
  0xb4   :  { %466 = vmatpush.msrb.mxu3 %v435_v31  ;;  %v431_v31 = vld [vmem:[#allocation9 + $0x1c0] sm:$0xff]  ;;  %445 = vmatpush.msrb.mxu2 %v405_v14  ;;  %v400_v14 = vld [vmem:[#allocation9 + $0xc8] sm:$0xff] }
  0xb6   :  { %467 = vmatpush.msrb.mxu3 %v433_v15 }
  0xb8   :  { %468 = vmatpush.msrb.mxu3 %v431_v31  ;;  %v426_v31 = vld [vmem:[#allocation9 + $0x198] sm:$0xff] }
 0x128   :  { %v180_v7 = vpop.f32.mrf.mxu0  ;;  %v200_v1 = vpop.f32.mrf.mxu1 }
 0x129   :  { %v181_v8 = vadd.f32 %v180_v7, %v155_v6  ;;  %v201_v10 = vadd.f32 %v200_v1, %v156_v12  ;;  %v432_v12 = vld [vmem:[#allocation9 + $0x1c8] sm:$0xff]  ;;  %v401_v6 = vld [vmem:[#allocation9 + $0xd0] sm:$0xff]  ;;  %v427_v7 = vld [vmem:[#allocation9 + $0x1a0] sm:$0xff] }
 0x12a   :  { %508 = vmatpush.msra.mxu1 %v432_v12  ;;  %v404_v1 = vld [vmem:[#allocation9 + $0xe8] sm:$0xff]  ;;  %v423_v12 = vld [vmem:[#allocation9 + $0x180] sm:$0xff] }
 0x12b   :  { %v203_v9 = vmul.f32 0.2, %v181_v8  ;;  %v204_v44 = vmul.f32 0.2, %v201_v10  ;;  %486 = vmatpush.msra.mxu0 %v404_v1  ;;  %v395_v1 = vld [vmem:[#allocation9 + $0xa0] sm:$0xff] }
 0x12c   :  { %509 = vmatpush.msra.mxu1 %v430_v5  ;;  %v421_v5 = vld [vmem:[#allocation9 + $0x170] sm:$0xff] }
 0x12d   :  { %v1176_v2 = vmax.f32 %v181_v8, %v203_v9  ;;  %v1178_v61 = vmax.f32 %v201_v10, %v204_v44  ;;  %v403_v10 = vld [vmem:[#allocation9 + $0xe0] sm:$0xff]  ;;  %v429_v44 = vld [vmem:[#allocation9 + $0x1b0] sm:$0xff]  ;;  %v402_v8 = vld [vmem:[#allocation9 + $0xd8] sm:$0xff] }
 0x12e   :  { %446 = vmatpush.msrb.mxu2 %v403_v10  ;;  %469 = vmatpush.msrb.mxu3 %v429_v44  ;;  %v428_v9 = vld [vmem:[#allocation9 + $0x1a8] sm:$0xff]  ;;  %v398_v10 = vld [vmem:[#allocation9 + $0xb8] sm:$0xff] }
 0x12f   :  { %v207_v39 = vmul.f32 %v1176_v2, %v1176_v2  ;;  %v208_v15 = vmul.f32 %v1178_v61, %v1178_v61  ;;  %487 = vmatpush.msra.mxu0 %v402_v8  ;;  %510 = vmatpush.msra.mxu1 %v428_v9  ;;  %v424_v44 = vld [vmem:[#allocation9 + $0x188] sm:$0xff]  ;;  %v393_v8 = vld [vmem:[#allocation9 + $0x90] sm:$0xff]  ;;  %v419_v9 = vld [vmem:[#allocation9 + $0x160] sm:$0xff] }
 0x130   :  { %447 = vmatpush.msrb.mxu2 %v401_v6  ;;  %470 = vmatpush.msrb.mxu3 %v427_v7  ;;  %v396_v6 = vld [vmem:[#allocation9 + $0xa8] sm:$0xff]  ;;  %v422_v7 = vld [vmem:[#allocation9 + $0x178] sm:$0xff] }
 0x131   :  { %289 = vmatmul.f32.vlgmr.msra.gmra.mxu2 %v207_v39  ;;  %309 = vmatmul.f32.vlgmr.msra.gmra.mxu3 %v208_v15 }
 0x132   :  { %329 = vmatmul.f32.vlgmr.msrb.gmra.mxu0 %v207_v39  ;;  %349 = vmatmul.f32.vlgmr.msrb.gmra.mxu1 %v208_v15  ;;  %v399_v39 = vld [vmem:[#allocation9 + $0xc0] sm:$0xff]  ;;  %v425_v15 = vld [vmem:[#allocation9 + $0x190] sm:$0xff] }
 0x133   :  { %448 = vmatpush.msrb.mxu2 %v399_v39  ;;  %471 = vmatpush.msrb.mxu3 %v425_v15  ;;  %v394_v39 = vld [vmem:[#allocation9 + $0x98] sm:$0xff]  ;;  %v420_v15 = vld [vmem:[#allocation9 + $0x168] sm:$0xff] }
 0x134   :  { %488 = vmatpush.msra.mxu0 %v400_v14  ;;  %511 = vmatpush.msra.mxu1 %v426_v31  ;;  %v391_v14 = vld [vmem:[#allocation9 + $0x80] sm:$0xff]  ;;  %v417_v31 = vld [vmem:[#allocation9 + $0x150] sm:$0xff] }
 0x135   :  { %449 = vmatpush.msrb.mxu2 %v397_v4  ;;  %472 = vmatpush.msrb.mxu3 %v423_v12  ;;  %v392_v4 = vld [vmem:[#allocation9 + $0x88] sm:$0xff]  ;;  %v418_v12 = vld [vmem:[#allocation9 + $0x158] sm:$0xff] }
 0x136   :  { %489 = vmatpush.msra.mxu0 %v398_v10  ;;  %512 = vmatpush.msra.mxu1 %v424_v44  ;;  %v389_v10 = vld [vmem:[#allocation9 + $0x70] sm:$0xff]  ;;  %v415_v44 = vld [vmem:[#allocation9 + $0x140] sm:$0xff] }
 0x137   :  { %450 = vmatpush.msrb.mxu2 %v395_v1  ;;  %473 = vmatpush.msrb.mxu3 %v421_v5  ;;  %v390_v1 = vld [vmem:[#allocation9 + $0x78] sm:$0xff]  ;;  %v416_v5 = vld [vmem:[#allocation9 + $0x148] sm:$0xff] }
 0x138   :  { %490 = vmatpush.msra.mxu0 %v396_v6  ;;  %513 = vmatpush.msra.mxu1 %v422_v7  ;;  %v387_v6 = vld [vmem:[#allocation9 + $0x60] sm:$0xff]  ;;  %v413_v7 = vld [vmem:[#allocation9 + $0x130] sm:$0xff] }
 0x139   :  { %451 = vmatpush.msrb.mxu2 %v393_v8  ;;  %474 = vmatpush.msrb.mxu3 %v419_v9  ;;  %v388_v8 = vld [vmem:[#allocation9 + $0x68] sm:$0xff]  ;;  %v414_v9 = vld [vmem:[#allocation9 + $0x138] sm:$0xff] }
 0x13a   :  { %491 = vmatpush.msra.mxu0 %v394_v39  ;;  %514 = vmatpush.msra.mxu1 %v420_v15  ;;  %v385_v39 = vld [vmem:[#allocation9 + $0x50] sm:$0xff]  ;;  %v411_v15 = vld [vmem:[#allocation9 + $0x120] sm:$0xff] }
 0x13b   :  { %452 = vmatpush.msrb.mxu2 %v391_v14  ;;  %475 = vmatpush.msrb.mxu3 %v417_v31  ;;  %v386_v14 = vld [vmem:[#allocation9 + $0x58] sm:$0xff]  ;;  %v412_v31 = vld [vmem:[#allocation9 + $0x128] sm:$0xff] }
 0x13c   :  { %492 = vmatpush.msra.mxu0 %v392_v4  ;;  %515 = vmatpush.msra.mxu1 %v418_v12  ;;  %v383_v4 = vld [vmem:[#allocation9 + $0x40] sm:$0xff]  ;;  %v409_v12 = vld [vmem:[#allocation9 + $0x110] sm:$0xff] }
 0x13d   :  { %453 = vmatpush.msrb.mxu2 %v389_v10  ;;  %476 = vmatpush.msrb.mxu3 %v415_v44  ;;  %v384_v10 = vld [vmem:[#allocation9 + $0x48] sm:$0xff]  ;;  %v410_v44 = vld [vmem:[#allocation9 + $0x118] sm:$0xff] }
 0x13e   :  { %493 = vmatpush.msra.mxu0 %v390_v1  ;;  %516 = vmatpush.msra.mxu1 %v416_v5  ;;  %v381_v1 = vld [vmem:[#allocation9 + $0x30] sm:$0xff]  ;;  %v407_v5 = vld [vmem:[#allocation9 + $0x100] sm:$0xff] }
 0x13f   :  { %454 = vmatpush.msrb.mxu2 %v387_v6  ;;  %477 = vmatpush.msrb.mxu3 %v413_v7  ;;  %v382_v6 = vld [vmem:[#allocation9 + $0x38] sm:$0xff]  ;;  %v408_v7 = vld [vmem:[#allocation9 + $0x108] sm:$0xff] }
 0x140   :  { %494 = vmatpush.msra.mxu0 %v388_v8  ;;  %517 = vmatpush.msra.mxu1 %v414_v9  ;;  %v379_v8 = vld [vmem:[#allocation9 + $0x20] sm:$0xff]  ;;  %v380_v9 = vld [vmem:[#allocation9 + $0x28] sm:$0xff] }
 0x141   :  { %455 = vmatpush.msrb.mxu2 %v385_v39  ;;  %478 = vmatpush.msrb.mxu3 %v411_v15  ;;  %v377_v39 = vld [vmem:[#allocation9 + $0x10] sm:$0xff]  ;;  %v378_v15 = vld [vmem:[#allocation9 + $0x18] sm:$0xff] }
 0x142   :  { %495 = vmatpush.msra.mxu0 %v386_v14  ;;  %518 = vmatpush.msra.mxu1 %v412_v31  ;;  %v375_v14 = vld [vmem:[#allocation9] sm:$0xff]  ;;  %v376_v31 = vld [vmem:[#allocation9 + $0x8] sm:$0xff] }
 0x143   :  { %456 = vmatpush.msrb.mxu2 %v383_v4  ;;  %479 = vmatpush.msrb.mxu3 %v409_v12 }
 0x144   :  { %496 = vmatpush.msra.mxu0 %v384_v10  ;;  %519 = vmatpush.msra.mxu1 %v410_v44 }
 0x145   :  { %457 = vmatpush.msrb.mxu2 %v381_v1  ;;  %480 = vmatpush.msrb.mxu3 %v407_v5 }
 0x146   :  { %497 = vmatpush.msra.mxu0 %v382_v6  ;;  %520 = vmatpush.msra.mxu1 %v408_v7  ;;  %v664_v7 = vld [vmem:[#allocation10 + $0xf8] sm:$0xff] }
 0x147   :  { %458 = vmatpush.msrb.mxu2 %v379_v8  ;;  %551 = vmatpush.msra.mxu3 %v985_v17  ;;  %v663_v8 = vld [vmem:[#allocation10 + $0xf0] sm:$0xff] }
 0x148   :  { %498 = vmatpush.msra.mxu0 %v380_v9  ;;  %591 = vmatpush.msrb.mxu1 %v991_v20  ;;  %v662_v9 = vld [vmem:[#allocation10 + $0xe8] sm:$0xff] }
 0x149   :  { %459 = vmatpush.msrb.mxu2 %v377_v39  ;;  %552 = vmatpush.msra.mxu3 %v995_v22  ;;  %v648_v39 = vld [vmem:[#allocation10 + $0x78] sm:$0xff] }
 0x14a   :  { %499 = vmatpush.msra.mxu0 %v378_v15  ;;  %592 = vmatpush.msrb.mxu1 %v1001_v24  ;;  %v661_v15 = vld [vmem:[#allocation10 + $0xe0] sm:$0xff] }
 0x14b   :  { %460 = vmatpush.msrb.mxu2 %v375_v14  ;;  %553 = vmatpush.msra.mxu3 %v1007_v26  ;;  %v647_v14 = vld [vmem:[#allocation10 + $0x70] sm:$0xff] }
 0x14c   :  { %500 = vmatpush.msra.mxu0 %v376_v31  ;;  %593 = vmatpush.msrb.mxu1 %v1011_v28  ;;  %v660_v31 = vld [vmem:[#allocation10 + $0xd8] sm:$0xff] }
 0x14d   :  { %531 = vmatpush.msra.mxu2 %v983_v16  ;;  %554 = vmatpush.msra.mxu3 %v1017_v30 }
 0x14e   :  { %571 = vmatpush.msrb.mxu0 %v987_v18  ;;  %594 = vmatpush.msrb.mxu1 %v1023_v33 }
 0x14f   :  { %532 = vmatpush.msra.mxu2 %v993_v21  ;;  %555 = vmatpush.msra.mxu3 %v1029_v35  ;;  %v1310_v35 = vld [vmem:[#allocation16_spill] sm:$0xff] }
 0x150   :  { %572 = vmatpush.msrb.mxu0 %v999_v23  ;;  %595 = vmatpush.msrb.mxu1 %v1035_v38 }
 0x151   :  { %533 = vmatpush.msra.mxu2 %v1003_v25  ;;  %556 = vmatpush.msra.mxu3 %v1041_v41  ;;  %v1313_v41 = vld [vmem:[#allocation25_spill] sm:$0xff] }
 0x152   :  { %573 = vmatpush.msrb.mxu0 %v1009_v27  ;;  %596 = vmatpush.msrb.mxu1 %v1047_v43 }
 0x153   :  { %534 = vmatpush.msra.mxu2 %v1015_v29  ;;  %557 = vmatpush.msra.mxu3 %v1053_v46  ;;  %v1315_v46 = vld [vmem:[#allocation27_spill] sm:$0xff] }
 0x154   :  { %574 = vmatpush.msrb.mxu0 %v1021_v32  ;;  %597 = vmatpush.msrb.mxu1 %v1059_v48  ;;  %v1317_v48 = vld [vmem:[#allocation29_spill] sm:$0xff] }
 0x155   :  { %535 = vmatpush.msra.mxu2 %v1027_v34  ;;  %558 = vmatpush.msra.mxu3 %v1065_v50  ;;  %v1318_v50 = vld [vmem:[#allocation20_spill] sm:$0xff] }
 0x156   :  { %575 = vmatpush.msrb.mxu0 %v1033_v37  ;;  %598 = vmatpush.msrb.mxu1 %v1071_v52  ;;  %v1311_v37 = vld [vmem:[#allocation23_spill] sm:$0xff] }
 0x157   :  { %536 = vmatpush.msra.mxu2 %v1039_v40  ;;  %559 = vmatpush.msra.mxu3 %v1077_v54  ;;  %v1312_v40 = vld [vmem:[#allocation17_spill] sm:$0xff] }
 0x158   :  { %576 = vmatpush.msrb.mxu0 %v1045_v42  ;;  %599 = vmatpush.msrb.mxu1 %v1083_v56  ;;  %v1322_v56 = vld [vmem:[#allocation24_spill] sm:$0xff] }
 0x159   :  { %537 = vmatpush.msra.mxu2 %v1051_v45  ;;  %560 = vmatpush.msra.mxu3 %v1089_v58  ;;  %v1314_v45 = vld [vmem:[#allocation18_spill] sm:$0xff]  ;;  %v1324_v58 = vld [vmem:[#allocation28_spill] sm:$0xff] }
 0x15a   :  { %577 = vmatpush.msrb.mxu0 %v1057_v47  ;;  %600 = vmatpush.msrb.mxu1 %v1095_v60  ;;  %v1316_v47 = vld [vmem:[#allocation19_spill] sm:$0xff] }
 0x15b   :  { %538 = vmatpush.msra.mxu2 %v1063_v49  ;;  %561 = vmatpush.msra.mxu3 %v1101_v63  ;;  %v439_v60 = vld [vmem:[%s1274_s5] sm:$0x3] }
 0x15c   :  { %578 = vmatpush.msrb.mxu0 %v1069_v51  ;;  %601 = vmatpush.msrb.mxu1 %v1107_v3  ;;  %v1319_v51 = vld [vmem:[#allocation31_spill] sm:$0xff] }
 0x15d   :  { %539 = vmatpush.msra.mxu2 %v1075_v53  ;;  %562 = vmatpush.msra.mxu3 %v1118_v11  ;;  %v1320_v53 = vld [vmem:[#allocation21_spill] sm:$0xff] }
 0x15e   :  { %579 = vmatpush.msrb.mxu0 %v1081_v55  ;;  %602 = vmatpush.msrb.mxu1 %v1124_v13  ;;  %v1321_v55 = vld [vmem:[#allocation22_spill] sm:$0xff]  ;;  %v441_v13 = vperm.slane %v439_v60, 0 }
 0x15f   :  { %540 = vmatpush.msra.mxu2 %v1087_v57  ;;  %563 = vmatpush.msra.mxu3 %v1130_v0  ;;  %v1323_v57 = vld [vmem:[#allocation26_spill] sm:$0xff] }
 0x160   :  { %580 = vmatpush.msrb.mxu0 %v1093_v59  ;;  %603 = vmatpush.msrb.mxu1 %v1136_v19  ;;  %v1325_v59 = vld [vmem:[#allocation30_spill] sm:$0xff] }
 0x161   :  { %541 = vmatpush.msra.mxu2 %v1099_v62  ;;  %564 = vmatpush.msra.mxu3 %v1142_v36  ;;  %v442_v62 = vperm.slane %v439_v60, 1 }
 0x162   :  { %581 = vmatpush.msrb.mxu0 %v1310_v35  ;;  %604 = vmatpush.msrb.mxu1 %v1311_v37  ;;  %v637_v35 = vld [vmem:[#allocation10 + $0x20] sm:$0xff]  ;;  %v650_v37 = vld [vmem:[#allocation10 + $0x88] sm:$0xff] }
 0x163   :  { %542 = vmatpush.msra.mxu2 %v1312_v40  ;;  %565 = vmatpush.msra.mxu3 %v1313_v41  ;;  %v649_v40 = vld [vmem:[#allocation10 + $0x80] sm:$0xff]  ;;  %v635_v41 = vld [vmem:[#allocation10 + $0x10] sm:$0xff] }
 0x164   :  { %582 = vmatpush.msrb.mxu0 %v1314_v45  ;;  %605 = vmatpush.msrb.mxu1 %v1315_v46 }
 0x165   :  { %543 = vmatpush.msra.mxu2 %v1316_v47  ;;  %566 = vmatpush.msra.mxu3 %v1317_v48 }
 0x166   :  { %583 = vmatpush.msrb.mxu0 %v1318_v50  ;;  %606 = vmatpush.msrb.mxu1 %v1319_v51 }
 0x167   :  { %544 = vmatpush.msra.mxu2 %v1320_v53 }
 0x168   :  { %584 = vmatpush.msrb.mxu0 %v1321_v55 }
 0x169   :  { %545 = vmatpush.msra.mxu2 %v1322_v56 }
 0x16a   :  { %585 = vmatpush.msrb.mxu0 %v1323_v57 }
 0x16b   :  { %546 = vmatpush.msra.mxu2 %v1324_v58 }
 0x16c   :  { %586 = vmatpush.msrb.mxu0 %v1325_v59 }
 0x1af   :  { %v330_v4 = vpop.f32.mrf.mxu0  ;;  %v350_v20 = vpop.f32.mrf.mxu1 }
 0x1b0   :  { %v331_v17 = vadd.f32 1e-08, %v330_v4  ;;  %v646_v4 = vld [vmem:[#allocation10 + $0x68] sm:$0xff] }
 0x1b2   :  { %v351_v22 = vadd.f32 %v350_v20, %v331_v17  ;;  %v659_v17 = vld [vmem:[#allocation10 + $0xd0] sm:$0xff]  ;;  %v645_v20 = vld [vmem:[#allocation10 + $0x60] sm:$0xff] }
 0x1b4   :  { %736 = vrsqrt.f32 %v351_v22  ;;  %v290_v16 = vpop.f32.mrf.mxu2  ;;  %v310_v21 = vpop.f32.mrf.mxu3  ;;  %vm369_vm7 = vweird.f32 %v351_v22 }
 0x1b5   :  { %v291_v18 = vadd.f32 1e-08, %v290_v16  ;;  %v644_v16 = vld [vmem:[#allocation10 + $0x58] sm:$0xff] }
 0x1b7   :  { %v311_v23 = vadd.f32 %v310_v21, %v291_v18  ;;  %v657_v18 = vld [vmem:[#allocation10 + $0xc0] sm:$0xff]  ;;  %v643_v21 = vld [vmem:[#allocation10 + $0x50] sm:$0xff] }
 0x1b9   :  { %738 = vrsqrt.f32 %v311_v23  ;;  %vm359_vm10 = vweird.f32 %v311_v23 }
 0x1ba   :  { %v737_v24 = vpop.eup %736 }
 0x1bb   :  { %v364_v25 = vmul.f32 %v737_v24, %v351_v22  ;;  %vm370_vm6 = vweird.f32 %v737_v24  ;;  %v658_v22 = vld [vmem:[#allocation10 + $0xc8] sm:$0xff] }
 0x1bc   :  { %vm371_vm8 = vmor %vm369_vm7, %vm370_vm6 }
 0x1bd   :  { %v365_v26 = vmul.f32 %v737_v24, %v364_v25  ;;  %v655_v25 = vld [vmem:[#allocation10 + $0xb0] sm:$0xff] }
 0x1bf   :  { %v739_v27 = vpop.eup %738  ;;  %v366_v28 = vmul.f32 0.5, %v365_v26  ;;  %v641_v26 = vld [vmem:[#allocation10 + $0x40] sm:$0xff] }
 0x1c0   :  { %v354_v29 = vmul.f32 %v739_v27, %v311_v23  ;;  %vm360_vm9 = vweird.f32 %v739_v27  ;;  %v656_v23 = vld [vmem:[#allocation10 + $0xb8] sm:$0xff] }
 0x1c1   :  { %v367_v30 = vsub.f32 1.5, %v366_v28  ;;  %vm361_vm11 = vmor %vm359_vm10, %vm360_vm9  ;;  %v640_v28 = vld [vmem:[#allocation10 + $0x38] sm:$0xff] }
 0x1c2   :  { %v355_v32 = vmul.f32 %v739_v27, %v354_v29  ;;  %v653_v29 = vld [vmem:[#allocation10 + $0xa0] sm:$0xff] }
 0x1c3   :  { %v368_v33 = vmul.f32 %v737_v24, %v367_v30  ;;  %v639_v30 = vld [vmem:[#allocation10 + $0x30] sm:$0xff] }
 0x1c4   :  { %v356_v34 = vmul.f32 0.5, %v355_v32  ;;  %v652_v32 = vld [vmem:[#allocation10 + $0x98] sm:$0xff] }
 0x1c5   :  { %v372_v38 = vsel %vm371_vm8, %v737_v24, %v368_v33  ;;  %v642_v24 = vld [vmem:[#allocation10 + $0x48] sm:$0xff] }
 0x1c6   :  { %v357_v42 = vsub.f32 1.5, %v356_v34  ;;  %v374_v43 = vmul.f32 %v372_v38, %v1178_v61  ;;  %v638_v33 = vld [vmem:[#allocation10 + $0x28] sm:$0xff]  ;;  %v651_v34 = vld [vmem:[#allocation10 + $0x90] sm:$0xff]  ;;  %v636_v38 = vld [vmem:[#allocation10 + $0x18] sm:$0xff] }
 0x1c8   :  { %481 = vmatmul.f32.vlgmr.msrb.gmra.mxu3 %v374_v43  ;;  %521 = vmatmul.f32.vlgmr.msra.gmra.mxu1 %v374_v43  ;;  %v358_v49 = vmul.f32 %v739_v27, %v357_v42  ;;  %v634_v42 = vld [vmem:[#allocation10 + $0x8] sm:$0xff]  ;;  %v633_v43 = vld [vmem:[#allocation10] sm:$0xff] }
 0x1c9   :  { %689 = vmatpush.msrb.mxu3 %v664_v7 }
 0x1ca   :  { %v362_v52 = vsel %vm361_vm11, %v739_v27, %v358_v49  ;;  %v654_v27 = vld [vmem:[#allocation10 + $0xa8] sm:$0xff] }
 0x1cb   :  { %v373_v54 = vmul.f32 %v362_v52, %v1176_v2  ;;  %690 = vmatpush.msrb.mxu3 %v663_v8 }
 0x1cd   :  { %461 = vmatmul.f32.vlgmr.msrb.gmra.mxu2 %v373_v54  ;;  %501 = vmatmul.f32.vlgmr.msra.gmra.mxu0 %v373_v54 }
 0x1ce   :  { %691 = vmatpush.msrb.mxu3 %v662_v9  ;;  %669 = vmatpush.msrb.mxu2 %v648_v39 }
 0x1d0   :  { %692 = vmatpush.msrb.mxu3 %v661_v15  ;;  %670 = vmatpush.msrb.mxu2 %v647_v14 }
 0x1d2   :  { %693 = vmatpush.msrb.mxu3 %v660_v31  ;;  %671 = vmatpush.msrb.mxu2 %v646_v4 }
 0x1d4   :  { %694 = vmatpush.msrb.mxu3 %v659_v17  ;;  %672 = vmatpush.msrb.mxu2 %v645_v20 }
 0x1d6   :  { %695 = vmatpush.msrb.mxu3 %v658_v22  ;;  %673 = vmatpush.msrb.mxu2 %v644_v16 }
 0x1d8   :  { %696 = vmatpush.msrb.mxu3 %v657_v18  ;;  %674 = vmatpush.msrb.mxu2 %v643_v21 }
 0x1da   :  { %697 = vmatpush.msrb.mxu3 %v656_v23  ;;  %675 = vmatpush.msrb.mxu2 %v642_v24 }
 0x1dc   :  { %698 = vmatpush.msrb.mxu3 %v655_v25  ;;  %676 = vmatpush.msrb.mxu2 %v641_v26 }
 0x1de   :  { %699 = vmatpush.msrb.mxu3 %v654_v27  ;;  %677 = vmatpush.msrb.mxu2 %v640_v28 }
 0x1e0   :  { %700 = vmatpush.msrb.mxu3 %v653_v29  ;;  %678 = vmatpush.msrb.mxu2 %v639_v30 }
 0x1e2   :  { %701 = vmatpush.msrb.mxu3 %v652_v32  ;;  %679 = vmatpush.msrb.mxu2 %v638_v33 }
 0x1e4   :  { %702 = vmatpush.msrb.mxu3 %v651_v34  ;;  %680 = vmatpush.msrb.mxu2 %v637_v35 }
 0x1e6   :  { %703 = vmatpush.msrb.mxu3 %v650_v37  ;;  %681 = vmatpush.msrb.mxu2 %v636_v38 }
 0x1e8   :  { %704 = vmatpush.msrb.mxu3 %v649_v40  ;;  %682 = vmatpush.msrb.mxu2 %v635_v41 }
 0x1ea   :  { %683 = vmatpush.msrb.mxu2 %v634_v42 }
 0x1ec   :  { %684 = vmatpush.msrb.mxu2 %v633_v43 }
 0x245   :  { %v522_v2 = vpop.f32.mrf.mxu1 }
 0x24a   :  { %v502_v63 = vpop.f32.mrf.mxu0 }
 0x24b   :  { %v503_v3 = vadd.f32 %v502_v63, %v442_v62  ;;  %v482_v12 = vpop.f32.mrf.mxu3 }
 0x24d   :  { %v523_v11 = vadd.f32 %v522_v2, %v503_v3 }
 0x24f   :  { %v526_v0 = vmul.f32 0.2, %v523_v11 }
 0x250   :  { %v462_v19 = vpop.f32.mrf.mxu2 }
 0x251   :  { %v1253_v36 = vmax.f32 %v523_v11, %v526_v0  ;;  %v463_v61 = vadd.f32 %v462_v19, %v441_v13 }
 0x253   :  { %v530_v10 = vmul.f32 %v1253_v36, %v1253_v36  ;;  %v483_v44 = vadd.f32 %v482_v12, %v463_v61  ;;  %v731_v61 = vld [vmem:[%s1276_s7] ss:$0 sm:$0xff] }
 0x255   :  { %v525_v1 = vmul.f32 0.2, %v483_v44  ;;  %567 = vmatmul.f32.vlgmr.msra.gmra.mxu3 %v530_v10  ;;  %607 = vmatmul.f32.vlgmr.msrb.gmra.mxu1 %v530_v10 }
 0x257   :  { %v1257_v5 = vmax.f32 %v483_v44, %v525_v1 }
 0x259   :  { %v529_v6 = vmul.f32 %v1257_v5, %v1257_v5 }
 0x25b   :  { %547 = vmatmul.f32.vlgmr.msra.gmra.mxu2 %v529_v6  ;;  %587 = vmatmul.f32.vlgmr.msrb.gmra.mxu0 %v529_v6 }
 0x2d2   :  { %v608_v47 = vpop.f32.mrf.mxu1 }
 0x2d8   :  { %v588_v45 = vpop.f32.mrf.mxu0  ;;  %v568_v51 = vpop.f32.mrf.mxu3 }
 0x2d9   :  { %v589_v46 = vadd.f32 1e-08, %v588_v45 }
 0x2db   :  { %v609_v48 = vadd.f32 %v608_v47, %v589_v46 }
 0x2dd   :  { %740 = vrsqrt.f32 %v609_v48  ;;  %vm627_vm13 = vweird.f32 %v609_v48 }
 0x2de   :  { %v548_v49 = vpop.f32.mrf.mxu2 }
 0x2df   :  { %v549_v50 = vadd.f32 1e-08, %v548_v49 }
 0x2e1   :  { %v569_v52 = vadd.f32 %v568_v51, %v549_v50 }
 0x2e3   :  { %v741_v53 = vpop.eup %740  ;;  %742 = vrsqrt.f32 %v569_v52  ;;  %vm617_vm0 = vweird.f32 %v569_v52 }
 0x2e4   :  { %v622_v54 = vmul.f32 %v741_v53, %v609_v48  ;;  %vm628_vm12 = vweird.f32 %v741_v53 }
 0x2e5   :  { %vm629_vm14 = vmor %vm627_vm13, %vm628_vm12 }
 0x2e6   :  { %v623_v55 = vmul.f32 %v741_v53, %v622_v54 }
 0x2e8   :  { %v624_v56 = vmul.f32 0.5, %v623_v55 }
 0x2e9   :  { %v743_v57 = vpop.eup %742 }
 0x2ea   :  { %v625_v58 = vsub.f32 1.5, %v624_v56  ;;  %v612_v59 = vmul.f32 %v743_v57, %v569_v52  ;;  %vm618_vm15 = vweird.f32 %v743_v57 }
 0x2eb   :  { %vm619_vm1 = vmor %vm617_vm0, %vm618_vm15 }
 0x2ec   :  { %v626_v60 = vmul.f32 %v741_v53, %v625_v58  ;;  %v613_v62 = vmul.f32 %v743_v57, %v612_v59 }
 0x2ee   :  { %v614_v63 = vmul.f32 0.5, %v613_v62  ;;  %v630_v3 = vsel %vm629_vm14, %v741_v53, %v626_v60 }
 0x2ef   :  { %v632_v2 = vmul.f32 %v630_v3, %v1253_v36 }
 0x2f0   :  { %v615_v11 = vsub.f32 1.5, %v614_v63 }
 0x2f1   :  { %705 = vmatmul.f32.vlgmr.msrb.gmra.mxu3 %v632_v2 }
 0x2f2   :  { %v616_v13 = vmul.f32 %v743_v57, %v615_v11 }
 0x2f4   :  { %v620_v0 = vsel %vm619_vm1, %v743_v57, %v616_v13 }
 0x2f5   :  { %v631_v19 = vmul.f32 %v620_v0, %v1257_v5 }
 0x2f7   :  { %685 = vmatmul.f32.vlgmr.msrb.gmra.mxu2 %v631_v19 }
 0x374   :  { %v706_v44 = vpop.f32.mrf.mxu3 }
 0x37a   :  { %v686_v12 = vpop.f32.mrf.mxu2 }
 0x37b   :  { %v687_v10 = vadd.f32 %v731_v61, %v686_v12 }
 0x37d   :  { %v707_v1 = vadd.f32 %v706_v44, %v687_v10 }
 0x37f   :  { %709 = vst [vmem:[%s1277_s8] sm:$0x3] %v707_v1 }
 0x380   :  { %714 = vsyncpa [#allocation3], 1 }
 0x381   :  { %715 = vsyncpa [#allocation5], 1 }
 0x382   :  { %716 = vsyncpa [#allocation8], 1 }
 0x383   :  { %717 = vsyncpa [#allocation11], 1 }

</bundles_post_ra>
